<compile_context>
chip_gen: v7x
topology: tpu7x:2x2x1
jax: 0.10.0
libtpu: 0.0.40
codegen_flags: <defaults>
</compile_context>

<pallas_src>
import functools

import jax
import jax.numpy as jnp
from jax.experimental import pallas as pl
from jax.experimental.pallas import tpu as pltpu


def _round_up(x, m):
    return (x + m - 1) // m * m


def _tpu_generation():
    """Returns (num_tensorcores, input_tile_budget_bytes, vmem_limit_cap_bytes)."""
    kind = ""
    try:
        kind = jax.local_devices()[0].device_kind.lower()
    except Exception:
        pass
    if "v7" in kind:
        # v7x: 2 TensorCores/chip but only 64 MiB VMEM per core -> smaller tiles.
        return 2, 26 * 1024 * 1024, 40 * 1024 * 1024
    # v5e / v6e: single TensorCore, 128 MiB VMEM -> bigger tiles (HBM roofline).
    return 1, 40 * 1024 * 1024, 56 * 1024 * 1024


def _distill_kl_kernel(y_s_ref, y_t_ref, o_ref, acc_ref, *,
                       T, batch, block_rows, k_steps):
    """Processes one (block_rows, C) tile of student/teacher logits."""
    p = pl.program_id(0)          # partial-sum index ("parallel", v7x cores)
    i = pl.program_id(1)          # batch-tile index  ("arbitrary" reduction)

    @pl.when(i == 0)
    def _():
        acc_ref[...] = jnp.zeros_like(acc_ref)

    inv_T = jnp.float32(1.0 / T)
    ys = y_s_ref[...]             # native dtype (f32 or bf16), no f32 copy
    yt = y_t_ref[...]

    # Row maxes on the raw logits: max commutes with the positive 1/T scale,
    # so no scaled f32 tile has to be materialized for the max pass.
    ms = jnp.max(ys, axis=1, keepdims=True).astype(jnp.float32)
    mt = jnp.max(yt, axis=1, keepdims=True).astype(jnp.float32)

    # Partition functions with 1/T folded into the exp argument; the element
    # chains read straight from the input buffers (f32 math for accuracy).
    zs = jnp.sum(jnp.exp((ys.astype(jnp.float32) - ms) * inv_T),
                 axis=1, keepdims=True)
    et = jnp.exp((yt.astype(jnp.float32) - mt) * inv_T)
    zt = jnp.sum(et, axis=1, keepdims=True)

    # log p_t - log p_s = diff + (lse_s - lse_t) with diff = (y_t - y_s)/T.
    # Since sum_c p_t == 1, the row KL is sum_c p_t*diff + (lse_s - lse_t),
    # and the teacher normalization is a single per-row divide (p_t never
    # materialized).  The divide is O(block_rows), so exact division is
    # essentially free here (approx=True would also be valid but looser).
    diff = (yt.astype(jnp.float32) - ys.astype(jnp.float32)) * inv_T
    row_num = jnp.sum(et * diff, axis=1, keepdims=True)
    row_const = (ms - mt) * inv_T + jnp.log(zs) - jnp.log(zt)
    row_kl = row_num / zt + row_const                      # (block_rows, 1)

    row0 = (p * k_steps + i) * block_rows

    # Fast path: full tile entirely inside the true batch -> no mask.
    @pl.when(row0 + block_rows <= batch)
    def _():
        acc_ref[...] += jnp.sum(row_kl, keepdims=True)

    # Slow path: partial last tile or clamped overflow step -> select-mask the
    # out-of-range rows (select, not multiply, so garbage Inf/NaN is dropped).
    @pl.when(row0 + block_rows > batch)
    def _():
        rows = row0 + jax.lax.broadcasted_iota(jnp.int32, row_kl.shape, 0)
        masked = jnp.where(rows < batch, row_kl, 0.0)
        acc_ref[...] += jnp.sum(masked, keepdims=True)

    @pl.when(i == k_steps - 1)
    def _():
        scale = jnp.float32(T * T / batch)
        o_ref[...] = jnp.broadcast_to(acc_ref[...] * scale, o_ref.shape)


def distill_kl(y_s, y_t, T, *, block_rows=None, interpret=False):
    """KL distillation loss: sum p_t*(log p_t - log p_s) * T^2 / B (PyTorch DistillKL)."""
    assert y_s.shape == y_t.shape and y_s.ndim == 2
    B, C = y_s.shape

    # Lane density: pad tiny class counts (CIFAR-style heads) up to one full
    # 128-lane vreg with very negative logits -> softmax weight exactly 0.
    if C < 128:
        pad = 128 - C
        y_s = jnp.pad(y_s, ((0, 0), (0, pad)), constant_values=-1e9)
        y_t = jnp.pad(y_t, ((0, 0), (0, pad)), constant_values=-1e9)
        C = 128

    itemsize = max(jnp.dtype(y_s.dtype).itemsize, jnp.dtype(y_t.dtype).itemsize)
    # dtype-native sublane tile: 8 rows f32, 16 bf16, 32 int8/fp8.
    sublane = {4: 8, 2: 16, 1: 32}.get(itemsize, 8)

    num_cores, tile_budget, vmem_cap = _tpu_generation()

    if block_rows is None:
        # Largest sublane-aligned row tile with 2 inputs x 2 pipeline buffers
        # of (block_rows, C) under the per-generation VMEM budget.
        max_rows = max(sublane,
                       (tile_budget // (2 * 2 * C * itemsize)) // sublane * sublane)
        block_rows = min(1024, max_rows)
    block_rows = max(sublane, _round_up(block_rows, sublane))
    block_rows = min(block_rows, _round_up(B, sublane))

    nblocks = (B + block_rows - 1) // block_rows
    # Partial-sum split only where it helps: 2 on v7x (two TensorCores), 1 on
    # v5e/v6e where the "parallel" axis is serialized anyway.
    num_partials = num_cores if nblocks >= num_cores else 1
    k_steps = (nblocks + num_partials - 1) // num_partials

    def in_map(p, i):
        # Overflow steps (p*k_steps + i >= nblocks) re-read the last tile; the
        # kernel masks those rows to zero, so clamping is safe.
        return (jnp.minimum(p * k_steps + i, nblocks - 1), 0)

    kernel = functools.partial(
        _distill_kl_kernel,
        T=float(T), batch=B, block_rows=block_rows, k_steps=k_steps)

    # Double-buffered inputs + a few MiB for compiler internal scratch,
    # capped per generation (v7x has only 64 MiB physical VMEM per core).
    in_bytes = 2 * 2 * block_rows * C * itemsize
    vmem_limit = int(min(max(in_bytes + (4 << 20), 16 << 20), vmem_cap))

    partials = pl.pallas_call(
        kernel,
        out_shape=jax.ShapeDtypeStruct((num_partials, 8, 128), jnp.float32),
        grid=(num_partials, k_steps),
        in_specs=[
            pl.BlockSpec((block_rows, C), in_map),
            pl.BlockSpec((block_rows, C), in_map),
        ],
        out_specs=pl.BlockSpec((1, 8, 128), lambda p, i: (p, 0, 0)),
        scratch_shapes=[pltpu.VMEM((1, 1), jnp.float32)],
        compiler_params=pltpu.CompilerParams(
            dimension_semantics=("parallel", "arbitrary"),
            vmem_limit_bytes=vmem_limit,
        ),
        interpret=interpret,
    )(y_s, y_t)

    # Each (8,128) output tile is filled with its (already scaled) partial sum.
    return jnp.sum(partials[:, 0, 0])


def _reference(y_s, y_t, T):
    # Pure-JAX reference of the PyTorch forward.
    y_s = y_s.astype(jnp.float32)
    y_t = y_t.astype(jnp.float32)
    log_p_s = jax.nn.log_softmax(y_s / T, axis=1)
    p_t = jax.nn.softmax(y_t / T, axis=1)
    log_p_t = jax.nn.log_softmax(y_t / T, axis=1)
    return jnp.sum(p_t * (log_p_t - log_p_s)) * (T ** 2) / y_s.shape[0]


if __name__ == "__main__":
    T = 4.0

    # Case 1: f32 logits, B not a multiple of the row tile -> multi-step
    # reduction grid, partial-tile masking (and the 2-partial split on v7x).
    B, C = 20, 128
    ks, kt = jax.random.split(jax.random.PRNGKey(0))
    y_s = jax.random.normal(ks, (B, C), dtype=jnp.float32)
    y_t = jax.random.normal(kt, (B, C), dtype=jnp.float32)
    loss = distill_kl(y_s, y_t, T, block_rows=8)
    jax.block_until_ready(loss)
    ref = _reference(y_s, y_t, T)
    assert jnp.allclose(loss, ref, rtol=1e-5, atol=1e-5), (loss, ref)

    # Case 2: bf16 logits straight from HBM (half the read bandwidth),
    # default auto tile (rounded to 16-row bf16 sublane tile), single step.
    B2, C2 = 16, 256
    k2s, k2t = jax.random.split(jax.random.PRNGKey(0), 2)
    y_s2 = jax.random.normal(k2s, (B2, C2), dtype=jnp.float32).astype(jnp.bfloat16)
    y_t2 = jax.random.normal(k2t, (B2, C2), dtype=jnp.float32).astype(jnp.bfloat16)
    loss2 = distill_kl(y_s2, y_t2, T)
    jax.block_until_ready(loss2)
    ref2 = _reference(y_s2, y_t2, T)
    assert jnp.allclose(loss2, ref2, rtol=1e-4, atol=1e-5), (loss2, ref2)

    # Case 3: CIFAR-style small class count (C < 128) -> lane-padding path.
    B3, C3 = 8, 10
    k3s, k3t = jax.random.split(jax.random.PRNGKey(0), 2)
    y_s3 = jax.random.normal(k3s, (B3, C3), dtype=jnp.float32)
    y_t3 = jax.random.normal(k3t, (B3, C3), dtype=jnp.float32)
    loss3 = distill_kl(y_s3, y_t3, T)
    jax.block_until_ready(loss3)
    ref3 = _reference(y_s3, y_t3, T)
    assert jnp.allclose(loss3, ref3, rtol=1e-5, atol=1e-5), (loss3, ref3)

    print("KERNEL_OK")
</pallas_src>

<mosaic_0001>
module attributes {stable_mosaic.version = 11 : i64} {
  func.func @_distill_kl_kernel(%arg0: i32, %arg1: i32, %arg2: memref<8x128xf32, #tpu.memory_space<vmem>>, %arg3: memref<8x128xf32, #tpu.memory_space<vmem>>, %arg4: memref<1x8x128xf32, #tpu.memory_space<vmem>>, %arg5: memref<1x1xf32, #tpu.memory_space<vmem>>) attributes {dimension_semantics = [#tpu.dimension_semantics<parallel>, #tpu.dimension_semantics<arbitrary>], iteration_bounds = array<i64: 1, 3>, scalar_prefetch = 0 : i64, scratch_operands = 1 : i64, tpu.core_type = #tpu.core_type<tc>, window_params = [{transform_indices = @transform_0, window_bounds = array<i64: 8, 128>}, {transform_indices = @transform_1, window_bounds = array<i64: 8, 128>}, {transform_indices = @transform_2, window_bounds = array<i64: 1, 8, 128>}]} {
    %c0_i32 = arith.constant 0 : i32
    %0 = arith.cmpi eq, %arg1, %c0_i32 : i32
    %1 = arith.extui %0 : i1 to i32
    %c0_i32_0 = arith.constant 0 : i32
    %2 = arith.cmpi ne, %1, %c0_i32_0 : i32
    scf.if %2 {
      %cst_18 = arith.constant 0.000000e+00 : f32
      %52 = vector.broadcast %cst_18 : f32 to vector<1x1xf32>
      %c0_19 = arith.constant 0 : index
      %c0_20 = arith.constant 0 : index
      %53 = vector.load %arg5[%c0_19, %c0_20] : memref<1x1xf32, #tpu.memory_space<vmem>>, vector<1x1xf32>
      tpu.vector_store %arg5[%c0_19, %c0_20], %52 {strides = array<i32>} : memref<1x1xf32, #tpu.memory_space<vmem>>, vector<1x1xf32>,
    } else {
    }
    %c0 = arith.constant 0 : index
    %c0_1 = arith.constant 0 : index
    %3 = vector.load %arg2[%c0, %c0_1] : memref<8x128xf32, #tpu.memory_space<vmem>>, vector<8x128xf32>
    %c0_2 = arith.constant 0 : index
    %c0_3 = arith.constant 0 : index
    %4 = vector.load %arg3[%c0_2, %c0_3] : memref<8x128xf32, #tpu.memory_space<vmem>>, vector<8x128xf32>
    %cst = arith.constant dense<0xFF800000> : vector<8xf32>
    %5 = vector.multi_reduction <maximumf>, %3, %cst [1] : vector<8x128xf32> to vector<8xf32>
    %6 = vector.shape_cast %5 : vector<8xf32> to vector<8x1xf32>
    %cst_4 = arith.constant dense<0xFF800000> : vector<8xf32>
    %7 = vector.multi_reduction <maximumf>, %4, %cst_4 [1] : vector<8x128xf32> to vector<8xf32>
    %8 = vector.shape_cast %7 : vector<8xf32> to vector<8x1xf32>
    %9 = vector.broadcast %6 : vector<8x1xf32> to vector<8x128xf32>
    %10 = arith.subf %3, %9 : vector<8x128xf32>
    %cst_5 = arith.constant 2.500000e-01 : f32
    %11 = vector.broadcast %cst_5 : f32 to vector<8x128xf32>
    %12 = arith.mulf %10, %11 : vector<8x128xf32>
    %13 = math.exp %12 : vector<8x128xf32>
    %cst_6 = arith.constant dense<0.000000e+00> : vector<8xf32>
    %14 = vector.multi_reduction <add>, %13, %cst_6 [1] : vector<8x128xf32> to vector<8xf32>
    %15 = vector.shape_cast %14 : vector<8xf32> to vector<8x1xf32>
    %16 = vector.broadcast %8 : vector<8x1xf32> to vector<8x128xf32>
    %17 = arith.subf %4, %16 : vector<8x128xf32>
    %cst_7 = arith.constant 2.500000e-01 : f32
    %18 = vector.broadcast %cst_7 : f32 to vector<8x128xf32>
    %19 = arith.mulf %17, %18 : vector<8x128xf32>
    %20 = math.exp %19 : vector<8x128xf32>
    %cst_8 = arith.constant dense<0.000000e+00> : vector<8xf32>
    %21 = vector.multi_reduction <add>, %20, %cst_8 [1] : vector<8x128xf32> to vector<8xf32>
    %22 = vector.shape_cast %21 : vector<8xf32> to vector<8x1xf32>
    %23 = arith.subf %4, %3 : vector<8x128xf32>
    %cst_9 = arith.constant 2.500000e-01 : f32
    %24 = vector.broadcast %cst_9 : f32 to vector<8x128xf32>
    %25 = arith.mulf %23, %24 : vector<8x128xf32>
    %26 = arith.mulf %20, %25 : vector<8x128xf32>
    %cst_10 = arith.constant dense<0.000000e+00> : vector<8xf32>
    %27 = vector.multi_reduction <add>, %26, %cst_10 [1] : vector<8x128xf32> to vector<8xf32>
    %28 = vector.shape_cast %27 : vector<8xf32> to vector<8x1xf32>
    %29 = arith.subf %6, %8 : vector<8x1xf32>
    %cst_11 = arith.constant 2.500000e-01 : f32
    %30 = vector.broadcast %cst_11 : f32 to vector<8x1xf32>
    %31 = arith.mulf %29, %30 : vector<8x1xf32>
    %32 = math.log %15 : vector<8x1xf32>
    %33 = arith.addf %31, %32 : vector<8x1xf32>
    %34 = math.log %22 : vector<8x1xf32>
    %35 = arith.subf %33, %34 : vector<8x1xf32>
    %36 = arith.divf %28, %22 : vector<8x1xf32>
    %37 = arith.addf %36, %35 : vector<8x1xf32>
    %c3_i32 = arith.constant 3 : i32
    %38 = arith.muli %arg0, %c3_i32 : i32
    %39 = arith.addi %38, %arg1 : i32
    %c8_i32 = arith.constant 8 : i32
    %40 = arith.muli %39, %c8_i32 : i32
    %c8_i32_12 = arith.constant 8 : i32
    %41 = arith.addi %40, %c8_i32_12 : i32
    %c20_i32 = arith.constant 20 : i32
    %42 = arith.cmpi sle, %41, %c20_i32 : i32
    %43 = arith.extui %42 : i1 to i32
    %c0_i32_13 = arith.constant 0 : i32
    %44 = arith.cmpi ne, %43, %c0_i32_13 : i32
    scf.if %44 {
      %c0_18 = arith.constant 0 : index
      %c0_19 = arith.constant 0 : index
      %52 = vector.load %arg5[%c0_18, %c0_19] : memref<1x1xf32, #tpu.memory_space<vmem>>, vector<1x1xf32>
      %53 = vector.shape_cast %37 : vector<8x1xf32> to vector<1x8x1xf32>
      %cst_20 = arith.constant dense<0.000000e+00> : vector<1xf32>
      %54 = vector.multi_reduction <add>, %53, %cst_20 [1, 2] : vector<1x8x1xf32> to vector<1xf32>
      %55 = vector.shape_cast %54 : vector<1xf32> to vector<1x1x1xf32>
      %56 = vector.extract %55[0, 0, 0] : f32 from vector<1x1x1xf32>
      %57 = vector.broadcast %56 : f32 to vector<1x1xf32>
      %58 = arith.addf %52, %57 : vector<1x1xf32>
      %c0_21 = arith.constant 0 : index
      %c0_22 = arith.constant 0 : index
      %59 = vector.load %arg5[%c0_21, %c0_22] : memref<1x1xf32, #tpu.memory_space<vmem>>, vector<1x1xf32>
      tpu.vector_store %arg5[%c0_21, %c0_22], %58 {strides = array<i32>} : memref<1x1xf32, #tpu.memory_space<vmem>>, vector<1x1xf32>,
    } else {
    }
    %c8_i32_14 = arith.constant 8 : i32
    %45 = arith.addi %40, %c8_i32_14 : i32
    %c20_i32_15 = arith.constant 20 : i32
    %46 = arith.cmpi sgt, %45, %c20_i32_15 : i32
    %47 = arith.extui %46 : i1 to i32
    %c0_i32_16 = arith.constant 0 : i32
    %48 = arith.cmpi ne, %47, %c0_i32_16 : i32
    scf.if %48 {
      %52 = tpu.iota {dimensions = array<i32: 0>} : vector<8x1xi32>
      %53 = vector.broadcast %40 : i32 to vector<8x1xi32>
      %54 = arith.addi %53, %52 : vector<8x1xi32>
      %c20_i32_18 = arith.constant 20 : i32
      %55 = vector.broadcast %c20_i32_18 : i32 to vector<8x1xi32>
      %56 = arith.cmpi slt, %54, %55 : vector<8x1xi32>
      %cst_19 = arith.constant 0.000000e+00 : f32
      %57 = vector.broadcast %cst_19 : f32 to vector<8x1xf32>
      %58 = arith.select %56, %37, %57 : vector<8x1xi1>, vector<8x1xf32>
      %c0_20 = arith.constant 0 : index
      %c0_21 = arith.constant 0 : index
      %59 = vector.load %arg5[%c0_20, %c0_21] : memref<1x1xf32, #tpu.memory_space<vmem>>, vector<1x1xf32>
      %60 = vector.shape_cast %58 : vector<8x1xf32> to vector<1x8x1xf32>
      %cst_22 = arith.constant dense<0.000000e+00> : vector<1xf32>
      %61 = vector.multi_reduction <add>, %60, %cst_22 [1, 2] : vector<1x8x1xf32> to vector<1xf32>
      %62 = vector.shape_cast %61 : vector<1xf32> to vector<1x1x1xf32>
      %63 = vector.extract %62[0, 0, 0] : f32 from vector<1x1x1xf32>
      %64 = vector.broadcast %63 : f32 to vector<1x1xf32>
      %65 = arith.addf %59, %64 : vector<1x1xf32>
      %c0_23 = arith.constant 0 : index
      %c0_24 = arith.constant 0 : index
      %66 = vector.load %arg5[%c0_23, %c0_24] : memref<1x1xf32, #tpu.memory_space<vmem>>, vector<1x1xf32>
      tpu.vector_store %arg5[%c0_23, %c0_24], %65 {strides = array<i32>} : memref<1x1xf32, #tpu.memory_space<vmem>>, vector<1x1xf32>,
    } else {
    }
    %c2_i32 = arith.constant 2 : i32
    %49 = arith.cmpi eq, %arg1, %c2_i32 : i32
    %50 = arith.extui %49 : i1 to i32
    %c0_i32_17 = arith.constant 0 : i32
    %51 = arith.cmpi ne, %50, %c0_i32_17 : i32
    scf.if %51 {
      %c0_18 = arith.constant 0 : index
      %c0_19 = arith.constant 0 : index
      %52 = vector.load %arg5[%c0_18, %c0_19] : memref<1x1xf32, #tpu.memory_space<vmem>>, vector<1x1xf32>
      %cst_20 = arith.constant 8.000000e-01 : f32
      %53 = vector.broadcast %cst_20 : f32 to vector<1x1xf32>
      %54 = arith.mulf %52, %53 : vector<1x1xf32>
      %55 = vector.shape_cast %54 : vector<1x1xf32> to vector<1x1x1xf32>
      %56 = vector.broadcast %55 : vector<1x1x1xf32> to vector<1x8x128xf32>
      %c0_21 = arith.constant 0 : index
      %c0_22 = arith.constant 0 : index
      %c0_23 = arith.constant 0 : index
      %57 = vector.load %arg4[%c0_21, %c0_22, %c0_23] : memref<1x8x128xf32, #tpu.memory_space<vmem>>, vector<1x8x128xf32>
      tpu.vector_store %arg4[%c0_21, %c0_22, %c0_23], %56 {strides = array<i32>} : memref<1x8x128xf32, #tpu.memory_space<vmem>>, vector<1x8x128xf32>,
    } else {
    }
    return
  }
  func.func @transform_0(%arg0: i32, %arg1: i32) -> (i32, i32) {
    %c3_i32 = arith.constant 3 : i32
    %0 = arith.muli %arg0, %c3_i32 : i32
    %1 = arith.addi %0, %arg1 : i32
    %c2_i32 = arith.constant 2 : i32
    %2 = arith.minsi %1, %c2_i32 : i32
    %c0_i32 = arith.constant 0 : i32
    %c0_i32_0 = arith.constant 0 : i32
    return %2, %c0_i32 : i32, i32
  }
  func.func @transform_1(%arg0: i32, %arg1: i32) -> (i32, i32) {
    %c3_i32 = arith.constant 3 : i32
    %0 = arith.muli %arg0, %c3_i32 : i32
    %1 = arith.addi %0, %arg1 : i32
    %c2_i32 = arith.constant 2 : i32
    %2 = arith.minsi %1, %c2_i32 : i32
    %c0_i32 = arith.constant 0 : i32
    %c0_i32_0 = arith.constant 0 : i32
    return %2, %c0_i32 : i32, i32
  }
  func.func @transform_2(%arg0: i32, %arg1: i32) -> (i32, i32, i32) {
    %c0_i32 = arith.constant 0 : i32
    %c0_i32_0 = arith.constant 0 : i32
    %c0_i32_1 = arith.constant 0 : i32
    return %arg0, %c0_i32, %c0_i32_0 : i32, i32, i32
  }
}

</mosaic_0001>

<bundles_post_ra>
// kernel: tpu_custom_call.1
= control target key start
LH: loop header
LB: loop body
LE: loop exit
PB: predicated region body
PF: predicated region fallthrough
CT: control target
= control target key end

     0   :  { %7 = vsyncpa [#allocation4], 0  ;;  %s908_s0 = inlined_call_operand.hbm [shape: f32[20,128], index: 0, kind: input, shape index: {}]   ;;  %s909_s1 = inlined_call_operand.hbm [shape: f32[20,128], index: 1, kind: input, shape index: {}]   ;;  %s910_s2 = inlined_call_operand.hbm [shape: f32[1,8,128], index: 2, kind: output, shape index: {}]  }
   0x1   :  { %9 = vsyncpa [#allocation4 + $0x1], 0 }
   0x2   :  { %10 = vsyncpa [#allocation7], 0 }
   0x3   :  { %12 = vsyncpa [#allocation7 + $0x1], 0 }
   0x4   :  { %13 = vsyncpa [#allocation5], 0  ;;  %s701_s9 = smov 0   ;;  %s703_s10 = smov 0  }
   0x5   :  { %s705_s11 = smov 0   ;;  %s707_s12 = smov 0  }
   0x6   :  { %s709_s13 = smov 0   ;;  %s711_s14 = smov 0  }
   0x7 LB: > { %s432_s15 = sadd.s32 4294967295, %s679_s14   ;;  %s28_s16 = sadd.s32 1, %s675_s13  ;;  %s679_s14 = sphi %s711_s14, %s19_s14   ;;  %s675_s13 = sphi %s709_s13, %s924_s13   ;;  %s671_s12 = sphi %s707_s12, %s923_s12   ;;  %s667_s11 = sphi %s705_s11, %s922_s11   ;;  %s663_s10 = sphi %s703_s10, %s921_s10   ;;  %s659_s9 = sphi %s701_s9, %s920_s9  }
   0x8   : > { %p29_p0 = scmp.ge.s32.totalorder %s28_s16, 3  ;;  %p37_p1 = scmp.lt.s32.totalorder %s675_s13, 2 }
   0x9   : > { %s46_s17 = sadd.s32 1, %s667_s11  ;;  %p53_p2 = scmp.ne.s32.totalorder %s667_s11, %s663_s10 }
   0xa   : > { %s926_s16 = smov (%p29_p0, %s28_s16), 0  ;;  %p54_p4 = scmp.eq.s32.totalorder %s679_s14, 0 }
   0xb   : > { %s738_s18 = scalar_select %p37_p1, %s675_s13, 2 }
   0xc   : > { %p41_p3 = scmp.lt.s32.totalorder %s926_s16, 2  ;;  %p59_p5 = scmp.ne.s32.totalorder %s663_s10, %s659_s9 }
   0xd   : > { %p60_p6 = scmp.eq.s32.totalorder %s432_s15, 0  ;;  %p55_p7 = por %p54_p4, %p53_p2 }
   0xe   : > { %s42_s19 = scalar_select %p41_p3, %s926_s16, 2 }
   0xf   : > { %p746_p8 = por %p60_p6, %p59_p5  ;;  %p470_p10 = scmp.lt.s32.totalorder %s679_s14, 3 }
  0x10   : > { %s43_s21 = ssub.s32 %s738_s18, %s42_s19  ;;  %s753_s22 = sand.u32 1, %s667_s11  }
  0x11   : > { %s912_s20 = scalar_select %p746_p8, 1, 0 }
  0x12   : > { %p44_p9 = scmp.eq.s32.totalorder %s43_s21, 0  ;;  %s436_s23 = sshll.u32 %s738_s18, 7 }
  0x13   : > { %s435_s25 = sshll.u32 %s753_s22, 3  ;;  %s765_s28 = scalar_lea.hbm %s908_s0, %s436_s23 }
  0x14   : > { %s757_s24 = scalar_select %p44_p9, %s667_s11, %s46_s17  }
  0x15   : > { %s147_s29 = scalar_lea.vmem [#allocation3], %s435_s25  ;;  %p769_p11 = pnand %p470_p10, %p55_p7 }
  0x16   : > { %s158_s30 = sshll.u32 %s147_s29, 4  ;;  %s144_s4 = scalar_lea.sflag [#allocation4], %s753_s22  ;;  %s773_s30 = int_to_ptr.vmem [resolvable:$true] %s158_s30 }
  0x17   : > { %s535_s5 = scalar_lea.hbm %s765_s28, 128  ;;  %p537_p1 = pneg %p769_p11 }
  0x18   : > { %p536_p0 = scmp.ne.s32.totalorder %s765_s28, %s535_s5  ;;  %s540_s8 = scalar_lea.hbm %s908_s0, 384 }
  0x19   : > { %p541_p4 = scmp.lt.u32.totalorder %s765_s28, %s908_s0  ;;  %p542_p5 = scmp.lt.u32.totalorder %s540_s8, %s535_s5 }
  0x1a   : > { %p538_p2 = pnand %p537_p1, %p536_p0  ;;  %p544_p7 = scmp.lt.u32.totalorder %s535_s5, %s765_s28 }
  0x1b   : > { %p543_p6 = por %p542_p5, %p541_p4 }
  0x1c   : > { %p539_p3 = pneg %p538_p2 }
  0x1d   : > { %p545_p9 = por %p544_p7, %p543_p6 }
  0x1f   : > { %p546_p10 = pnand %p545_p9, %p539_p3 }
  0x21   : > { %549 = shalt.err (!%p546_p10)
}
  0x22   : > { %s550_s19 = scalar_lea.vmem %s773_s30, 128  ;;  %s681_s21 = smov [#allocation3]  }
  0x23   : > { %p551_p0 = scmp.ne.s32.totalorder %s773_s30, %s550_s19  ;;  %s555_s26 = sshll.u32 %s681_s21, 4  ;;  %s556_s26 = int_to_ptr.vmem [resolvable:$false] %s555_s26 }
  0x24   : > { %s557_s27 = scalar_lea.vmem %s556_s26, 256  ;;  %p558_p13 = scmp.lt.s32.totalorder %s773_s30, %s556_s26 }
  0x25   : > { %p553_p2 = pnand %p551_p0, %p537_p1  ;;  %p559_p4 = scmp.lt.s32.totalorder %s557_s27, %s550_s19 }
  0x27   : > { %p554_p12 = pneg %p553_p2  ;;  %p560_p5 = por %p559_p4, %p558_p13 }
  0x29   : > { %p561_p6 = pnand %p560_p5, %p554_p12 }
  0x2b   : > { %564 = shalt.err (!%p561_p6)
}
  0x2c   : > { %466 = dma.hbm_to_vmem [thread:$0]  (!%p769_p11), %s765_s28, 128, %s773_s30, %s144_s4  }
  0x2d   : > { %p914_p3 = scmp.lt.s32.totalorder %s679_s14, 4  ;;  %p915_p7 = scmp.ge.s32.totalorder %s679_s14, 1 }
  0x2e   : > { %s816_s7 = scalar_lea.hbm %s909_s1, %s436_s23  ;;  %s169_s8 = scalar_lea.vmem [#allocation6], %s435_s25 }
  0x2f   : > { %p807_p9 = pnand %p915_p7, %p914_p3  ;;  %s180_s9 = sshll.u32 %s169_s8, 4  ;;  %s181_s9 = int_to_ptr.vmem [resolvable:$true] %s180_s9 }
  0x30   : > { %s166_s28 = scalar_lea.sflag [#allocation7], %s753_s22  ;;  %s565_s30 = scalar_lea.hbm %s816_s7, 128 }
  0x31   : > { %s916_s29 = scalar_select %p807_p9, 1, 0 }
  0x32   : > { %p566_p12 = scmp.ne.s32.totalorder %s816_s7, %s565_s30  ;;  %s570_s23 = scalar_lea.hbm %s909_s1, 384 }
  0x33   : > { %p571_p0 = scmp.lt.u32.totalorder %s816_s7, %s909_s1  ;;  %p572_p2 = scmp.lt.u32.totalorder %s570_s23, %s565_s30 }
  0x34   : > { %p568_p13 = pnand %p566_p12, %p537_p1  ;;  %p574_p5 = scmp.lt.u32.totalorder %s565_s30, %s816_s7 }
  0x35   : > { %p573_p4 = por %p572_p2, %p571_p0 }
  0x36   : > { %p569_p10 = pneg %p568_p13 }
  0x37   : > { %p575_p6 = por %p574_p5, %p573_p4 }
  0x39   : > { %p576_p3 = pnand %p575_p6, %p569_p10 }
  0x3b   : > { %579 = shalt.err (!%p576_p3)
}
  0x3c   : > { %s580_s22 = scalar_lea.vmem %s181_s9, 128  ;;  %s682_s25 = smov [#allocation6]  }
  0x3d   : > { %p581_p7 = scmp.ne.s32.totalorder %s181_s9, %s580_s22  ;;  %s585_s21 = sshll.u32 %s682_s25, 4  ;;  %s586_s21 = int_to_ptr.vmem [resolvable:$false] %s585_s21 }
  0x3e   : > { %s587_s26 = scalar_lea.vmem %s586_s21, 256  ;;  %p588_p8 = scmp.lt.s32.totalorder %s181_s9, %s586_s21 }
  0x3f   : > { %p583_p12 = pnand %p581_p7, %p537_p1  ;;  %p589_p9 = scmp.lt.s32.totalorder %s587_s26, %s580_s22 }
  0x41   : > { %p584_p13 = pneg %p583_p12  ;;  %p590_p0 = por %p589_p9, %p588_p8 }
  0x43   : > { %p591_p2 = pnand %p590_p0, %p584_p13 }
  0x45   : > { %594 = shalt.err (!%p591_p2)
}
  0x46   : > { %469 = dma.hbm_to_vmem [thread:$0]  (!%p769_p11), %s816_s7, 128, %s181_s9, %s166_s28  }
  0x47   : > { %p917_p10 = scmp.ne.s32.totalorder %s916_s29, 0 }
  0x48   : > { %s191_s27 = sand.u32 (!%p917_p10), 1, %s663_s10   ;;  %p918_p1 = scmp.ne.s32.totalorder (!%p917_p10), %s912_s20, 0 }
  0x49   : > { %189 = sbr.rel (%p917_p10) target bundleno = 1007 (0x3ef), region = 28  ;;  %s440_s5 = sshll.u32 (!%p917_p10), %s191_s27, 3 }
  0x4a   : > { %s192_s6 = scalar_lea.sflag (!%p917_p10), [#allocation4], %s191_s27  ;;  %s195_s8 = scalar_lea.vmem (!%p917_p10), [#allocation3], %s440_s5 }
  0x50   : > { %646 = dma.done.wait (%p918_p1), %s192_s6, 128  }
  0x51   : > { %648 = vsyncadd (%p918_p1), %s192_s6, 4294967168  ;;  %s201_s30 = scalar_lea.sflag [#allocation7], %s191_s27  ;;  %s204_s18 = scalar_lea.vmem [#allocation6], %s440_s5 }
  0x52   : > { %650 = dma.done.wait (%p918_p1), %s201_s30, 128  }
  0x53   : > { %652 = vsyncadd (%p918_p1), %s201_s30, 4294967168  ;;  %p442_p8 = scmp.ne.s32.totalorder %s671_s12, 0 }
  0x54   : > { %vm237_vm0 = vcmask (!%p442_p8), 0   ;;  %v683_v0 = vmov (!%p442_p8), 0.0  }
  0x55   : > { %236 = sbr.rel (%p442_p8) target bundleno = 92 (0x5c), region = 40  ;;  %238 = vst.msk [vmem:[#allocation2] sm:$0x1] (!%p442_p8), %vm237_vm0, %v683_v0 }
  0x5c PF: > { %v239_v1 = vld [vmem:[%s195_s8] sm:$0xff]  ;;  %v240_v2 = vld [vmem:[%s204_s18] sm:$0xff]  ;;  %s443_s20 = sshll.u32 %s671_s12, 3 }
  0x5d   : > { %241 = vmax.xlane.f32.xlu0 %v239_v1  ;;  %v257_v11 = vsub.f32 %v240_v2, %v239_v1  ;;  %s855_s3 = sadd.s32 8, %s443_s20 }
  0x5e   : > { %p444_p11 = scmp.gt.s32.totalorder %s855_s3, 20 }
  0x5f   : > { %v258_v13 = vmul.f32 0.25, %v257_v11  ;;  %vm282_vm1 = vcmask (!%p444_p11), 7168   ;;  %v281_v38 = vld [vmem:[#allocation2] sm:$0x1] (!%p444_p11)  ;;  %vm295_vm2 = vcmask (!%p444_p11), 0  }
  0x61   : > { %243 = vmax.xlane.f32.xlu0 %v240_v2 }
  0xea   : > { %v242_v3 = vpop.xlane.xlu0 %241 }
  0xeb   : > { %v245_v4 = vsub.f32 %v239_v1, %v242_v3 }
  0xed   : > { %v246_v5 = vmul.f32 0.25, %v245_v4 }
  0xee   : > { %v244_v6 = vpop.xlane.xlu0 %243 }
  0xef   : > { %v251_v7 = vsub.f32 %v240_v2, %v244_v6  ;;  %v247_v8 = vmul.f32 1.442695, %v246_v5  ;;  %v262_v18 = vsub.f32 %v242_v3, %v244_v6 }
  0xf1   : > { %v252_v9 = vmul.f32 0.25, %v251_v7  ;;  %524 = vpow2.f32 %v247_v8  ;;  %v263_v21 = vmul.f32 0.25, %v262_v18 }
  0xf3   : > { %v253_v10 = vmul.f32 1.442695, %v252_v9 }
  0xf5   : > { %526 = vpow2.f32 %v253_v10 }
  0xfb   : > { %v525_v12 = vpop.eup %524 }
  0xfc   : > { %249 = vadd.xlane.f32.xlu1 %v525_v12 }
  0xff   : > { %v527_v14 = vpop.eup %526 }
 0x100   : > { %255 = vadd.xlane.f32.xlu1 %v527_v14  ;;  %v259_v15 = vmul.f32 %v527_v14, %v258_v13 }
 0x102   : > { %260 = vadd.xlane.f32.xlu0 %v259_v15 }
 0x189   : > { %v250_v16 = vpop.xlane.xlu1 %249 }
 0x18a   : > { %528 = vlog2.f32 %v250_v16 }
 0x18d   : > { %v256_v17 = vpop.xlane.xlu1 %255 }
 0x18e   : > { %530 = vlog2.f32 %v256_v17 }
 0x18f   : > { %532 = vrcp.f32 %v256_v17  ;;  %v261_v26 = vpop.xlane.xlu0 %260 }
 0x194   : > { %v529_v19 = vpop.eup %528 }
 0x195   : > { %v265_v20 = vmul.f32 0.6931472, %v529_v19 }
 0x197   : > { %v266_v24 = vadd.f32 %v265_v20, %v263_v21  ;;  %280 = sbr.rel (%p444_p11) target bundleno = 624 (0x270), region = 44 }
 0x198   : > { %v531_v22 = vpop.eup %530 }
 0x199   : > { %v533_v23 = vpop.eup %532  ;;  %v268_v25 = vmul.f32 0.6931472, %v531_v22 }
 0x19a   : > { %v271_v28 = vmul.f32 %v533_v23, %v261_v26 }
 0x19b   : > { %v269_v27 = vsub.f32 %v266_v24, %v268_v25 }
 0x19d   : > { %v272_v29 = vadd.f32 %v271_v28, %v269_v27 }
 0x19f   : > { %v283_v30 = vsel %vm282_vm1, %v272_v29, 0.0 }
 0x1a0   : > { %284 = vadd.xlane.f32.xlu0 %v283_v30 }
 0x22d   : > { %v285_v31 = vpop.xlane.xlu0 %284 }
 0x22e   : > { %v286_v32 = vrot.slane %v285_v31, 4 }
 0x230   : > { %v287_v33 = vadd.f32 %v286_v32, %v285_v31 }
 0x232   : > { %v288_v34 = vrot.slane %v287_v33, 2 }
 0x234   : > { %v289_v35 = vadd.f32 %v288_v34, %v287_v33 }
 0x236   : > { %v290_v36 = vrot.slane %v289_v35, 1 }
 0x238   : > { %v291_v37 = vadd.f32 %v290_v36, %v289_v35 }
 0x23a   : > { %451 = vpush %v291_v37 }
 0x26b   : > { %s452_s29 = spop %451 }
 0x26c   : > { %v293_v39 = vstv %s452_s29 }
 0x26d   : > { %v294_v40 = vadd.f32 %v293_v39, %v281_v38 }
 0x26f   : > { %296 = vst.msk [vmem:[#allocation2] sm:$0x1] %vm295_vm2, %v294_v40 }
 0x270 PF: > { %p445_p9 = scmp.le.s32.totalorder %s855_s3, 20 }
 0x271   : > { %v301_v41 = vlaneseq (!%p445_p9)  ;;  %v303_v42 = vstv (!%p445_p9), %s443_s20  ;;  %vm308_vm3 = vcmask (!%p445_p9), 7168   ;;  %vm321_vm5 = vcmask (!%p445_p9), 0  }
 0x272   : > { %300 = sbr.rel (%p445_p9) target bundleno = 842 (0x34a), region = 48 }
 0x273   : > { %v302_v43 = vshrl.u32 (!%p445_p9), %v301_v41, 7 }
 0x275   : > { %v304_v44 = vadd.s32 (!%p445_p9), %v303_v42, %v302_v43 }
 0x276   : > { %v307_v54 = vld [vmem:[#allocation2] sm:$0x1] (!%p445_p9) }
 0x277   : > { %vm305_vm4 = vcmp.lt.s32.totalorder (!%p445_p9), %v304_v44, 20 }
 0x278   : > { %v306_v45 = vsel (!%p445_p9), %vm305_vm4, %v272_v29, 0.0 }
 0x279   : > { %v309_v46 = vsel %vm308_vm3, %v306_v45, 0.0 }
 0x27a   : > { %310 = vadd.xlane.f32.xlu0 %v309_v46 }
 0x307   : > { %v311_v47 = vpop.xlane.xlu0 %310 }
 0x308   : > { %v312_v48 = vrot.slane %v311_v47, 4 }
 0x30a   : > { %v313_v49 = vadd.f32 %v312_v48, %v311_v47 }
 0x30c   : > { %v314_v50 = vrot.slane %v313_v49, 2 }
 0x30e   : > { %v315_v51 = vadd.f32 %v314_v50, %v313_v49 }
 0x310   : > { %v316_v52 = vrot.slane %v315_v51, 1 }
 0x312   : > { %v317_v53 = vadd.f32 %v316_v52, %v315_v51 }
 0x314   : > { %453 = vpush %v317_v53 }
 0x345   : > { %s454_s7 = spop %453 }
 0x346   : > { %v319_v55 = vstv %s454_s7 }
 0x347   : > { %v320_v56 = vadd.f32 %v319_v55, %v307_v54 }
 0x349   : > { %322 = vst.msk [vmem:[#allocation2] sm:$0x1] %vm321_vm5, %v320_v56 }
 0x34a PF: > { %p446_p4 = scmp.ne.s32.totalorder %s671_s12, 2 }
 0x34b   : > { %v330_v58 = vlaneseq (!%p446_p4)  ;;  %v684_v59 = vmov (!%p446_p4), 0  }
 0x34c   : > { %326 = sbr.rel (%p446_p4) target bundleno = 982 (0x3d6), region = 52  ;;  %534 = vset.pattern.permute.xlu0 (!%p446_p4), %v684_v59 }
 0x34d   : > { %v331_v61 = vshrl.u32 (!%p446_p4), %v330_v58, 7 }
 0x34f   : > { %v332_v62 = vsub.s32 (!%p446_p4), 0, %v331_v61 }
 0x350   : > { %v327_v57 = vld [vmem:[#allocation2] sm:$0x1] (!%p446_p4) }
 0x351   : > { %v328_v60 = vmul.f32 (!%p446_p4), 0.8, %v327_v57 }
 0x353   : > { %v333_v63 = vrot.slane %v328_v60, %v332_v62 }
 0x355   : > { %335 = vperm.xlu0 %534, %v333_v63  }
 0x3d4   : > { %v336_v0 = vpop.permute.xlu0 %335 }
 0x3d5   : > { %338 = vst [vmem:[#allocation8] sm:$0xff] %v336_v0 }
 0x3d6 PF: > { %p864_p5 = scmp.eq.s32.totalorder %s432_s15, 2  ;;  %s685_s12 = smov [#allocation8]  }
 0x3d7   : > { %s348_s28 = sshll.u32 %s685_s12, 4  ;;  %s349_s28 = int_to_ptr.vmem [resolvable:$true] %s348_s28 }
 0x3d8   : > { %s595_s4 = scalar_lea.vmem %s349_s28, 128  ;;  %p602_p12 = scmp.lt.s32.totalorder %s349_s28, %s349_s28 }
 0x3d9   : > { %p596_p6 = scmp.ne.s32.totalorder %s349_s28, %s595_s4  ;;  %p603_p13 = scmp.lt.s32.totalorder %s595_s4, %s595_s4 }
 0x3db   : > { %p597_p3 = pnand %p596_p6, %p864_p5  ;;  %p604_p0 = por %p603_p13, %p602_p12 }
 0x3dd   : > { %p598_p7 = pneg %p597_p3 }
 0x3df   : > { %p605_p2 = pnand %p604_p0, %p598_p7 }
 0x3e1   : > { %608 = shalt.err (!%p605_p2)
}
 0x3e2   : > { %s609_s15 = scalar_lea.hbm %s910_s2, 128 }
 0x3e3   : > { %p610_p10 = scmp.ne.s32.totalorder %s910_s2, %s609_s15  ;;  %p615_p11 = scmp.lt.u32.totalorder %s609_s15, %s910_s2 }
 0x3e5   : > { %p611_p1 = pnand %p610_p10, %p864_p5 }
 0x3e7   : > { %p612_p8 = pneg %p611_p1 }
 0x3e9   : > { %p617_p9 = pnand %p615_p11, %p612_p8 }
 0x3eb   : > { %620 = shalt.err (!%p617_p9)
}
 0x3ec   : > { %460 = dma.vmem_to_hbm [thread:$0]  (%p864_p5), %s349_s28, 128, %s910_s2, [#allocation5]  }
 0x3ed   : > { %654 = dma.done.wait (%p864_p5), [#allocation5], 128  }
 0x3ee   : > { %656 = vsyncadd (%p864_p5), [#allocation5], 4294967168 }
 0x3ef PF: > { %s19_s14 = sadd.s32 1, %s679_s14   ;;  %s920_s9 = smov %s663_s10 }
 0x3f0   : > { %p16_p4 = scmp.ge.s32.totalorder %s19_s14, 5   ;;  %s921_s10 = smov %s667_s11 }
 0x3f1   : > { %s922_s11 = smov %s757_s24  ;;  %s923_s12 = smov %s675_s13 }
 0x3f2   : > { %s924_s13 = smov %s926_s16  ;;  %18 = sbr.rel (!%p16_p4) target bundleno = 7 (0x7), region = 95 }
 0x3f9   :  { %361 = vsyncpa [#allocation4], 1 }
 0x3fa   :  { %363 = vsyncpa [#allocation4 + $0x1], 1 }
 0x3fb   :  { %364 = vsyncpa [#allocation7], 1 }
 0x3fc   :  { %366 = vsyncpa [#allocation7 + $0x1], 1 }
 0x3fd   :  { %367 = vsyncpa [#allocation5], 1 }
 0x3fe   :  { %369 = vsyncpa [#allocation5 + $0x1], 1 }

</bundles_post_ra>
